<compile_context>
chip_gen: v5e
topology: v5e:2x2
jax: 0.10.0
libtpu: 0.0.40
codegen_flags: <defaults>
</compile_context>

<pallas_src>
import functools

import jax
import jax.numpy as jnp
from jax.experimental import pallas as pl
from jax.experimental.pallas import tpu as pltpu

POWER = 0.3
COMPLEX_LOSS_RATIO = 0.113
EPSILON = 1e-16

_LANES = 128
_BLOCK_ROWS = 1024        # DMA block: 1024 * 8 * 128 * 4B = 4 MiB f32 per input per step
_INNER_ROWS = 256         # in-kernel compute chunk: bounds live temporaries to ~1 MiB each
_VMEM_LIMIT_BYTES = 40 << 20   # > v5e's 16 MiB scoped default, < physical VMEM everywhere


def _loss_kernel(pred_ref, targ_ref, out_ref, *, power, epsilon,
                 complex_loss_ratio, block_rows, inner_rows):
    """One grid step: reduce a (block_rows, sublanes, 128) pair of tiles to a
    single (sublanes, 128) fused partial sum (spec + ratio * complex)."""
    n_inner = block_rows // inner_rows

    def chunk_sum(start):
        # Upcast inside the kernel so bf16 callers read HBM at native width.
        p = pred_ref[pl.ds(start, inner_rows)].astype(jnp.float32) + epsilon
        t = targ_ref[pl.ds(start, inner_rows)].astype(jnp.float32) + epsilon
        # Power-law compression: explicit exp(power*log(x)) = 2 EUP ops + 1 VPU
        # mul per element (no lax.pow special-case selects, same NaN behavior).
        p = jnp.exp(power * jnp.log(p))
        t = jnp.exp(power * jnp.log(t))
        d_abs = jnp.abs(t) - jnp.abs(p)
        d = t - p
        combined = d_abs * d_abs + complex_loss_ratio * (d * d)
        # Reduce only over the leading (row-group) axis: pure vreg adds on the
        # VPU, no cross-lane XLU reduce, no serial scalar accumulator.
        return jnp.sum(combined, axis=0)

    if n_inner == 1:
        out_ref[0] = chunk_sum(0)
    else:
        def body(j, acc):
            start = pl.multiple_of(j * inner_rows, inner_rows)
            return acc + chunk_sum(start)

        out_ref[0] = jax.lax.fori_loop(1, n_inner, body, chunk_sum(0))


def _plain_sum(p, t, power, epsilon, complex_loss_ratio):
    """Tail (< one Pallas block) handled in plain JAX — avoids padding and the
    full-array-copy jnp.pad fallback of the previous revision."""
    p = jnp.exp(power * jnp.log(p.astype(jnp.float32) + epsilon))
    t = jnp.exp(power * jnp.log(t.astype(jnp.float32) + epsilon))
    d_abs = jnp.abs(t) - jnp.abs(p)
    d = t - p
    return jnp.sum(d_abs * d_abs + complex_loss_ratio * (d * d))


def _candidate_dimension_semantics():
    """Only core-level semantics actually shards a grid axis across v7x's two
    TensorCores; plain "parallel" is the safe choice on single-TC chips."""
    choices = [("parallel",)]
    try:
        kind = jax.devices()[0].device_kind.lower()
    except Exception:  # pragma: no cover
        kind = ""
    if "v7" in kind and hasattr(pltpu, "CORE_PARALLEL"):
        choices.insert(0, (pltpu.CORE_PARALLEL,))
    return choices


def power_law_compressed_loss(prediction, target,
                              power=POWER,
                              complex_loss_ratio=COMPLEX_LOSS_RATIO,
                              epsilon=EPSILON):
    assert prediction.shape == target.shape
    n_elems = prediction.size

    flat_p = prediction.reshape(-1)
    flat_t = target.reshape(-1)

    # bf16 pairs use the native packed (16, 128) tile; f32 uses (8, 128).
    bf16_pair = (prediction.dtype == jnp.bfloat16 and target.dtype == jnp.bfloat16)
    sublanes = 16 if bf16_pair else 8
    chunk = sublanes * _LANES

    total = jnp.zeros((), jnp.float32)
    n_main = 0

    r_total = n_elems // chunk
    if r_total > 0:
        block_rows = min(_BLOCK_ROWS, r_total)
        num_blocks = r_total // block_rows            # only full blocks go to Pallas
        n_main = num_blocks * block_rows * chunk
        inner_rows = _INNER_ROWS if block_rows % _INNER_ROWS == 0 else block_rows

        p3d = flat_p[:n_main].reshape(num_blocks * block_rows, sublanes, _LANES)
        t3d = flat_t[:n_main].reshape(num_blocks * block_rows, sublanes, _LANES)

        kernel = functools.partial(
            _loss_kernel, power=power, epsilon=epsilon,
            complex_loss_ratio=complex_loss_ratio,
            block_rows=block_rows, inner_rows=inner_rows)

        cost = pl.CostEstimate(
            flops=12 * n_main,                 # adds/subs/muls/squares per element pair
            transcendentals=4 * n_main,        # 2x log + 2x exp per element pair
            bytes_accessed=n_main * (prediction.dtype.itemsize
                                     + target.dtype.itemsize)
                           + num_blocks * chunk * 4)

        partials = None
        last_err = None
        for dim_sem in _candidate_dimension_semantics():
            try:
                partials = pl.pallas_call(
                    kernel,
                    out_shape=jax.ShapeDtypeStruct(
                        (num_blocks, sublanes, _LANES), jnp.float32),
                    grid_spec=pltpu.PrefetchScalarGridSpec(
                        num_scalar_prefetch=0,
                        grid=(num_blocks,),
                        in_specs=[
                            pl.BlockSpec((block_rows, sublanes, _LANES),
                                         lambda i: (i, 0, 0)),
                            pl.BlockSpec((block_rows, sublanes, _LANES),
                                         lambda i: (i, 0, 0)),
                        ],
                        out_specs=pl.BlockSpec((1, sublanes, _LANES),
                                               lambda i: (i, 0, 0)),
                    ),
                    compiler_params=pltpu.CompilerParams(
                        dimension_semantics=dim_sem,
                        vmem_limit_bytes=_VMEM_LIMIT_BYTES),
                    cost_estimate=cost,
                )(p3d, t3d)
                break
            except Exception as err:   # pragma: no cover — v7x CORE_PARALLEL fallback
                last_err = err
        if partials is None:
            raise last_err

        total = total + jnp.sum(partials)

    if n_main < n_elems:
        total = total + _plain_sum(flat_p[n_main:], flat_t[n_main:],
                                   power, epsilon, complex_loss_ratio)

    return total * jnp.float32(1.0 / n_elems)


def _reference(prediction, target,
               power=POWER, complex_loss_ratio=COMPLEX_LOSS_RATIO,
               epsilon=EPSILON):
    p = jnp.power(prediction.astype(jnp.float32) + epsilon, power)
    t = jnp.power(target.astype(jnp.float32) + epsilon, power)
    spec_loss = jnp.mean((jnp.abs(t) - jnp.abs(p)) ** 2)
    complex_loss = jnp.mean((t - p) ** 2)
    return spec_loss + complex_loss * complex_loss_ratio


if __name__ == "__main__":
    key = jax.random.PRNGKey(0)
    k1, k2 = jax.random.split(key)
    # Spectrogram-magnitude-like (non-negative) inputs, NCHW: (B, C, H, W)
    shape = (2, 4, 16, 16)
    prediction = jnp.abs(jax.random.normal(k1, shape, dtype=jnp.float32))
    target = jnp.abs(jax.random.normal(k2, shape, dtype=jnp.float32))

    loss = power_law_compressed_loss(prediction, target)
    loss = jax.block_until_ready(loss)

    ref = jax.block_until_ready(_reference(prediction, target))
    assert jnp.allclose(loss, ref, rtol=1e-4, atol=1e-5), (loss, ref)

    print("KERNEL_OK")
</pallas_src>

<mosaic_0001>
module attributes {stable_mosaic.version = 11 : i64} {
  func.func @_loss_kernel(%arg0: i32, %arg1: memref<2x8x128xf32, #tpu.memory_space<vmem>>, %arg2: memref<2x8x128xf32, #tpu.memory_space<vmem>>, %arg3: memref<1x8x128xf32, #tpu.memory_space<vmem>>) attributes {dimension_semantics = [#tpu.dimension_semantics<parallel>], iteration_bounds = array<i64: 1>, scalar_prefetch = 0 : i64, scratch_operands = 0 : i64, tpu.core_type = #tpu.core_type<tc>, window_params = [{transform_indices = @transform_0, window_bounds = array<i64: 2, 8, 128>}, {transform_indices = @transform_1, window_bounds = array<i64: 2, 8, 128>}, {transform_indices = @transform_2, window_bounds = array<i64: 1, 8, 128>}]} {
    %c0 = arith.constant 0 : index
    %c0_0 = arith.constant 0 : index
    %c0_1 = arith.constant 0 : index
    %0 = vector.load %arg1[%c0, %c0_0, %c0_1] : memref<2x8x128xf32, #tpu.memory_space<vmem>>, vector<2x8x128xf32>
    %cst = arith.constant 1.000000e-16 : f32
    %1 = vector.broadcast %cst : f32 to vector<2x8x128xf32>
    %2 = arith.addf %0, %1 : vector<2x8x128xf32>
    %c0_2 = arith.constant 0 : index
    %c0_3 = arith.constant 0 : index
    %c0_4 = arith.constant 0 : index
    %3 = vector.load %arg2[%c0_2, %c0_3, %c0_4] : memref<2x8x128xf32, #tpu.memory_space<vmem>>, vector<2x8x128xf32>
    %cst_5 = arith.constant 1.000000e-16 : f32
    %4 = vector.broadcast %cst_5 : f32 to vector<2x8x128xf32>
    %5 = arith.addf %3, %4 : vector<2x8x128xf32>
    %6 = math.log %2 : vector<2x8x128xf32>
    %cst_6 = arith.constant 3.000000e-01 : f32
    %7 = vector.broadcast %cst_6 : f32 to vector<2x8x128xf32>
    %8 = arith.mulf %7, %6 : vector<2x8x128xf32>
    %9 = math.exp %8 : vector<2x8x128xf32>
    %10 = math.log %5 : vector<2x8x128xf32>
    %cst_7 = arith.constant 3.000000e-01 : f32
    %11 = vector.broadcast %cst_7 : f32 to vector<2x8x128xf32>
    %12 = arith.mulf %11, %10 : vector<2x8x128xf32>
    %13 = math.exp %12 : vector<2x8x128xf32>
    %14 = math.absf %13 : vector<2x8x128xf32>
    %15 = math.absf %9 : vector<2x8x128xf32>
    %16 = arith.subf %14, %15 : vector<2x8x128xf32>
    %17 = arith.subf %13, %9 : vector<2x8x128xf32>
    %18 = arith.mulf %16, %16 : vector<2x8x128xf32>
    %19 = arith.mulf %17, %17 : vector<2x8x128xf32>
    %cst_8 = arith.constant 1.130000e-01 : f32
    %20 = vector.broadcast %cst_8 : f32 to vector<2x8x128xf32>
    %21 = arith.mulf %20, %19 : vector<2x8x128xf32>
    %22 = arith.addf %18, %21 : vector<2x8x128xf32>
    %cst_9 = arith.constant dense<0.000000e+00> : vector<8x128xf32>
    %23 = vector.multi_reduction <add>, %22, %cst_9 [0] : vector<2x8x128xf32> to vector<8x128xf32>
    %c0_10 = arith.constant 0 : index
    %c0_11 = arith.constant 0 : index
    %c0_12 = arith.constant 0 : index
    %24 = vector.load %arg3[%c0_10, %c0_11, %c0_12] : memref<1x8x128xf32, #tpu.memory_space<vmem>>, vector<1x8x128xf32>
    %25 = vector.shape_cast %24 : vector<1x8x128xf32> to vector<8x128xf32>
    %26 = vector.shape_cast %23 : vector<8x128xf32> to vector<1x8x128xf32>
    tpu.vector_store %arg3[%c0_10, %c0_11, %c0_12], %26 {strides = array<i32>} : memref<1x8x128xf32, #tpu.memory_space<vmem>>, vector<1x8x128xf32>,
    return
  }
  func.func @transform_0(%arg0: i32) -> (i32, i32, i32) {
    %c0_i32 = arith.constant 0 : i32
    %c0_i32_0 = arith.constant 0 : i32
    %c0_i32_1 = arith.constant 0 : i32
    return %arg0, %c0_i32, %c0_i32_0 : i32, i32, i32
  }
  func.func @transform_1(%arg0: i32) -> (i32, i32, i32) {
    %c0_i32 = arith.constant 0 : i32
    %c0_i32_0 = arith.constant 0 : i32
    %c0_i32_1 = arith.constant 0 : i32
    return %arg0, %c0_i32, %c0_i32_0 : i32, i32, i32
  }
  func.func @transform_2(%arg0: i32) -> (i32, i32, i32) {
    %c0_i32 = arith.constant 0 : i32
    %c0_i32_0 = arith.constant 0 : i32
    %c0_i32_1 = arith.constant 0 : i32
    return %arg0, %c0_i32, %c0_i32_0 : i32, i32, i32
  }
}

</mosaic_0001>

<bundles_post_ra>
// kernel: tpu_custom_call.1
= control target key start
LH: loop header
LB: loop body
LE: loop exit
PB: predicated region body
PF: predicated region fallthrough
CT: control target
= control target key end

     0   :  { %7 = vsyncpa [#allocation3], 0  ;;  %s236_s0 = inlined_call_operand.hbm [shape: f32[2,8,128], index: 0, kind: input, shape index: {}]   ;;  %s237_s1 = inlined_call_operand.hbm [shape: f32[2,8,128], index: 1, kind: input, shape index: {}]   ;;  %s238_s2 = inlined_call_operand.hbm [shape: f32[1,8,128], index: 2, kind: output, shape index: {}]  }
   0x1   :  { %8 = vsyncpa [#allocation6], 0 }
   0x2   :  { %9 = vsyncpa [#allocation4], 0  ;;  %s14_s11 = sshll.u32 %s236_s0, 4  ;;  %s207_s12 = smov [#allocation2]   ;;  %s15_s11 = int_to_ptr.hbm [resolvable:$true] %s14_s11 }
   0x3   :  { %s16_s13 = sshll.u32 %s207_s12, 4  ;;  %s27_s16 = sshll.u32 %s237_s1, 4  ;;  %s17_s13 = int_to_ptr.vmem [resolvable:$true] %s16_s13  ;;  %s28_s16 = int_to_ptr.hbm [resolvable:$true] %s27_s16 }
   0x4   :  { %s208_s17 = smov 128   ;;  %s209_s18 = smov 8  }
   0x5   :  { %22 = dma.hbm_to_vmem [thread:$0]  %s15_s11, 256, %s17_s13, [#allocation3], %s208_s17, %s208_s17, %s209_s18  }
   0x6   :  { %s210_s19 = smov [#allocation5]  }
   0x7   :  { %s29_s20 = sshll.u32 %s210_s19, 4  ;;  %s30_s20 = int_to_ptr.vmem [resolvable:$true] %s29_s20 }
   0x8   :  { %35 = dma.hbm_to_vmem [thread:$0]  %s28_s16, 256, %s30_s20, [#allocation6], %s208_s17, %s208_s17, %s209_s18  }
   0x9   :  { %201 = dma.done.wait [#allocation3], 256  }
   0xa   :  { %202 = vsyncadd [#allocation3], 4294967040 }
   0xb   :  { %203 = dma.done.wait [#allocation6], 256  }
   0xc   :  { %204 = vsyncadd [#allocation6], 4294967040  ;;  %v44_v0 = vld [vmem:[#allocation2] sm:$0xff]  ;;  %v45_v1 = vld [vmem:[#allocation2 + $0x8] sm:$0xff]  ;;  %s211_s0 = smov [#allocation7]   ;;  %s97_s23 = sshll.u32 %s238_s2, 4  ;;  %s98_s23 = int_to_ptr.hbm [resolvable:$true] %s97_s23 }
   0xd   :  { %v48_v2 = vld [vmem:[#allocation5] sm:$0xff]  ;;  %v46_v3 = vadd.f32 1e-16, %v44_v0  ;;  %v47_v4 = vadd.f32 1e-16, %v45_v1  ;;  %v49_v5 = vld [vmem:[#allocation5 + $0x8] sm:$0xff] }
   0xe   :  { %v50_v6 = vadd.f32 1e-16, %v48_v2  ;;  %v51_v7 = vadd.f32 1e-16, %v49_v5  ;;  %s95_s1 = sshll.u32 %s211_s0, 4  ;;  %s96_s1 = int_to_ptr.vmem [resolvable:$true] %s95_s1 }
   0xf   :  { %113 = vlog2.f32 %v46_v3 }
  0x10   :  { %115 = vlog2.f32 %v47_v4 }
  0x11   :  { %117 = vlog2.f32 %v50_v6 }
  0x12   :  { %119 = vlog2.f32 %v51_v7 }
  0x15   :  { %v114_v8 = vpop.eup %113 }
  0x16   :  { %v116_v9 = vpop.eup %115  ;;  %v53_v10 = vmul.f32 0.6931472, %v114_v8 }
  0x17   :  { %v118_v11 = vpop.eup %117  ;;  %v55_v12 = vmul.f32 0.6931472, %v116_v9 }
  0x18   :  { %v120_v13 = vpop.eup %119  ;;  %v56_v14 = vmul.f32 0.3, %v53_v10  ;;  %v63_v15 = vmul.f32 0.6931472, %v118_v11 }
  0x19   :  { %v57_v16 = vmul.f32 0.3, %v55_v12  ;;  %v65_v17 = vmul.f32 0.6931472, %v120_v13 }
  0x1a   :  { %v58_v18 = vmul.f32 1.442695, %v56_v14  ;;  %v66_v19 = vmul.f32 0.3, %v63_v15 }
  0x1b   :  { %v60_v20 = vmul.f32 1.442695, %v57_v16  ;;  %v67_v21 = vmul.f32 0.3, %v65_v17 }
  0x1c   :  { %121 = vpow2.f32 %v58_v18  ;;  %v68_v22 = vmul.f32 1.442695, %v66_v19 }
  0x1d   :  { %123 = vpow2.f32 %v60_v20  ;;  %v70_v23 = vmul.f32 1.442695, %v67_v21 }
  0x1e   :  { %125 = vpow2.f32 %v68_v22 }
  0x1f   :  { %127 = vpow2.f32 %v70_v23 }
  0x22   :  { %v122_v24 = vpop.eup %121 }
  0x23   :  { %v124_v25 = vpop.eup %123  ;;  %v74_v26 = vand.u32 2147483647, %v122_v24 }
  0x24   :  { %v126_v27 = vpop.eup %125  ;;  %v75_v28 = vand.u32 2147483647, %v124_v25 }
  0x25   :  { %v128_v29 = vpop.eup %127  ;;  %v72_v30 = vand.u32 2147483647, %v126_v27  ;;  %v78_v31 = vsub.f32 %v126_v27, %v122_v24 }
  0x26   :  { %v73_v32 = vand.u32 2147483647, %v128_v29  ;;  %v79_v33 = vsub.f32 %v128_v29, %v124_v25 }
  0x27   :  { %v76_v34 = vsub.f32 %v72_v30, %v74_v26  ;;  %v82_v35 = vmul.f32 %v78_v31, %v78_v31 }
  0x28   :  { %v77_v36 = vsub.f32 %v73_v32, %v75_v28  ;;  %v83_v37 = vmul.f32 %v79_v33, %v79_v33 }
  0x29   :  { %v80_v38 = vmul.f32 %v76_v34, %v76_v34  ;;  %v84_v39 = vmul.f32 0.113, %v82_v35 }
  0x2a   :  { %v81_v40 = vmul.f32 %v77_v36, %v77_v36  ;;  %v85_v41 = vmul.f32 0.113, %v83_v37 }
  0x2b   :  { %v86_v42 = vadd.f32 %v84_v39, %v80_v38 }
  0x2c   :  { %v87_v43 = vadd.f32 %v85_v41, %v81_v40 }
  0x2e   :  { %v88_v44 = vadd.f32 %v87_v43, %v86_v42 }
  0x30   :  { %89 = vst [vmem:[#allocation7] sm:$0xff] %v88_v44 }
  0x31   :  { %100 = dma.vmem_to_hbm [thread:$0]  %s96_s1, 128, %s98_s23, [#allocation4]  }
  0x32   :  { %205 = dma.done.wait [#allocation4], 128  }
  0x33   :  { %206 = vsyncadd [#allocation4], 4294967168 }
  0x34   :  { %105 = vsyncpa [#allocation3], 1 }
  0x35   :  { %106 = vsyncpa [#allocation6], 1 }
  0x36   :  { %107 = vsyncpa [#allocation4], 1 }

</bundles_post_ra>
